<compile_context>
chip_gen: v6e
topology: v6e:2x2x1
jax: 0.10.0
libtpu: 0.0.40
codegen_flags: <defaults>
</compile_context>

<pallas_src>
import numpy as np
import jax
import jax.numpy as jnp
from jax.experimental import pallas as pl
from jax.experimental.pallas import tpu as pltpu


def _slot_lr_kernel(s_ref, b_ref, out_ref):
    # s_ref  : (4, TB)  rows = [u_score, i_score, genre_sum_score, bag_len]  (batch on lanes)
    # b_ref  : (1,)     Linear bias (SMEM scalar)
    # out_ref: (1, TB)  sigmoid(logits), lane-dense store
    s = s_ref[...]                                   # (4, TB) single vreg-group load
    u_s = s[0:1, :]                                  # (1, TB)
    i_s = s[1:2, :]
    g_sum = s[2:3, :]
    bag_len = s[3:4, :]
    g_mean = g_sum / jnp.maximum(bag_len, 1.0)       # EmbeddingBag 'mean' (empty bag -> 0)
    logits = u_s + i_s + g_mean + b_ref[0]           # Linear(3E->1) after the score fold
    out_ref[...] = jax.nn.sigmoid(logits)            # lane-dense (1, TB) store


def _round_up(x, m):
    return ((x + m - 1) // m) * m


def _derive_tile(B, batch_tile):
    """Lane-multiple batch tile; >= 2 grid steps when possible (v7x megacore)."""
    bt = max(128, (int(batch_tile) // 128) * 128)    # force TB to a multiple of 128
    B128 = _round_up(max(int(B), 1), 128)
    if B128 <= 128:
        return 128, 128                              # single tiny tile (one TC is enough)
    half = _round_up((B128 + 1) // 2, 128)           # split batch so grid >= 2
    TB = min(bt, half)
    B_pad = _round_up(B128, TB)
    return TB, B_pad


def slot_lr_rank_forward(params, uid, iid, user_genres, user_genres_offset,
                         *, batch_tile=8192):
    """Forward pass of SlotLRRank: wrapper folds Linear into the tables, Pallas kernel
    does the bag-mean + 3-way combine + bias + sigmoid over lane-dense batch tiles."""
    E = params["uid_emb"].shape[1]
    B = int(uid.shape[0])
    L = int(user_genres.shape[0])

    w = params["lr_w"].reshape(3, E).astype(jnp.float32)          # rows [w_u; w_i; w_g]
    b = params["lr_b"].reshape(1).astype(jnp.float32)             # (1,) SMEM scalar

    # --- fold Linear weight slices into the tables: one scalar score per vocab row ---
    u_tbl = params["uid_emb"].astype(jnp.float32) @ w[0]          # (U,)
    i_tbl = params["iid_emb"].astype(jnp.float32) @ w[1]          # (I,)
    g_tbl = params["genre_emb"].astype(jnp.float32) @ w[2]        # (G,)

    u_score = u_tbl[uid]                                          # (B,) scalar gathers only
    i_score = i_tbl[iid]                                          # (B,)

    # --- ragged EmbeddingBag bookkeeping: bag id per flat index + bag lengths ---
    offsets = user_genres_offset.astype(jnp.int32)                # (B,)
    ends = jnp.concatenate([offsets[1:], jnp.array([L], jnp.int32)])
    lengths = (ends - offsets).astype(jnp.float32)                # (B,)
    seg = jnp.searchsorted(offsets, jnp.arange(L, dtype=jnp.int32),
                           side="right").astype(jnp.int32) - 1    # bag id per flat idx
    g_sum_score = jax.ops.segment_sum(g_tbl[user_genres], seg,
                                      num_segments=B,
                                      indices_are_sorted=True)    # (B,) 1-D segment sum

    # --- stack to a (4, B_pad) lane-dense slab: 16 B/example streamed through the kernel ---
    TB, B_pad = _derive_tile(B, batch_tile)
    pad = B_pad - B
    scores = jnp.stack([u_score, i_score, g_sum_score, lengths], axis=0)  # (4, B)
    scores = jnp.pad(scores, ((0, 0), (0, pad)))                           # (4, B_pad)

    grid = (B_pad // TB,)
    cost = pl.CostEstimate(
        flops=int(6 * B_pad),
        transcendentals=int(B_pad),
        bytes_accessed=int(4 * (5 * B_pad + 1)),
    )

    out = pl.pallas_call(
        _slot_lr_kernel,
        out_shape=jax.ShapeDtypeStruct((1, B_pad), jnp.float32),
        grid=grid,
        in_specs=[
            pl.BlockSpec((4, TB), lambda i: (0, i)),              # streamed score slab
            pl.BlockSpec(memory_space=pltpu.MemorySpace.SMEM),    # bias scalar
        ],
        out_specs=pl.BlockSpec((1, TB), lambda i: (0, i)),        # lane-dense output row
        compiler_params=pltpu.CompilerParams(
            dimension_semantics=("parallel",),    # shard batch tiles across v7x's 2 TCs
            vmem_limit_bytes=32 * 1024 * 1024,    # headroom even on v7x's 64 MiB VMEM
        ),
        cost_estimate=cost,
    )(scores, b)

    return out[0, :B].reshape(B, 1)


def _reference(params, uid, iid, user_genres, user_genres_offset):
    """Pure-JAX replica of the exact PyTorch forward (gather, bag-mean, concat, linear)."""
    B = int(uid.shape[0])
    L = int(user_genres.shape[0])
    offsets = user_genres_offset.astype(jnp.int32)
    ends = jnp.concatenate([offsets[1:], jnp.array([L], jnp.int32)])
    lengths = (ends - offsets).astype(jnp.float32)
    seg = jnp.searchsorted(offsets, jnp.arange(L, dtype=jnp.int32),
                           side="right").astype(jnp.int32) - 1
    u = params["uid_emb"][uid]
    it = params["iid_emb"][iid]
    g_flat = params["genre_emb"][user_genres]
    g_sum = jax.ops.segment_sum(g_flat, seg, num_segments=B, indices_are_sorted=True)
    g_mean = g_sum / jnp.maximum(lengths[:, None], 1.0)
    x_cat = jnp.concatenate([u, it, g_mean], axis=1)
    return jax.nn.sigmoid(x_cat @ params["lr_w"].T + params["lr_b"])


if __name__ == "__main__":
    user_count, item_count, genres_count, E = 50, 100, 20, 32

    key = jax.random.PRNGKey(0)
    k = jax.random.split(key, 6)
    params = {
        "uid_emb": jax.random.normal(k[0], (user_count, E), jnp.float32),
        "iid_emb": jax.random.normal(k[1], (item_count, E), jnp.float32),
        "genre_emb": jax.random.normal(k[2], (genres_count, E), jnp.float32),
        "lr_w": 0.1 * jax.random.normal(k[3], (1, 3 * E), jnp.float32),
        "lr_b": jax.random.normal(k[4], (1,), jnp.float32),
    }

    # --- case 1: tiny batch (single 128-lane tile), includes an empty genre bag ---
    B = 8
    uid = jax.random.randint(k[5], (B,), 0, user_count, dtype=jnp.int32)
    iid = jax.random.randint(jax.random.fold_in(key, 7), (B,), 0, item_count,
                             dtype=jnp.int32)
    lengths_np = np.array([2, 3, 1, 4, 2, 0, 3, 2], np.int32)
    offsets_np = np.concatenate([[0], np.cumsum(lengths_np)[:-1]]).astype(np.int32)
    L = int(lengths_np.sum())
    user_genres = jax.random.randint(jax.random.fold_in(key, 11), (L,), 0,
                                     genres_count, dtype=jnp.int32)
    user_genres_offset = jnp.asarray(offsets_np)

    y = slot_lr_rank_forward(params, uid, iid, user_genres, user_genres_offset)
    y = jax.block_until_ready(y)
    assert y.shape == (B, 1) and y.dtype == jnp.float32
    ref = _reference(params, uid, iid, user_genres, user_genres_offset)
    np.testing.assert_allclose(np.asarray(y), np.asarray(ref), rtol=1e-5, atol=1e-5)

    # --- case 2: mid batch -> grid of 2 tiles (exercises multi-step grid / megacore path) ---
    B2 = 300
    rng = np.random.RandomState(0)
    uid2 = jnp.asarray(rng.randint(0, user_count, size=B2).astype(np.int32))
    iid2 = jnp.asarray(rng.randint(0, item_count, size=B2).astype(np.int32))
    lengths2 = rng.randint(0, 6, size=B2).astype(np.int32)
    offsets2 = np.concatenate([[0], np.cumsum(lengths2)[:-1]]).astype(np.int32)
    L2 = int(lengths2.sum())
    genres2 = jnp.asarray(rng.randint(0, genres_count, size=L2).astype(np.int32))
    offsets2 = jnp.asarray(offsets2)

    y2 = slot_lr_rank_forward(params, uid2, iid2, genres2, offsets2)
    y2 = jax.block_until_ready(y2)
    assert y2.shape == (B2, 1) and y2.dtype == jnp.float32
    ref2 = _reference(params, uid2, iid2, genres2, offsets2)
    np.testing.assert_allclose(np.asarray(y2), np.asarray(ref2), rtol=1e-5, atol=1e-5)

    print("KERNEL_OK")
</pallas_src>

<mosaic_0001>
module attributes {stable_mosaic.version = 11 : i64} {
  func.func @_slot_lr_kernel(%arg0: i32, %arg1: memref<4x128xf32, #tpu.memory_space<vmem>>, %arg2: memref<1xf32, #tpu.memory_space<smem>>, %arg3: memref<1x128xf32, #tpu.memory_space<vmem>>) attributes {dimension_semantics = [#tpu.dimension_semantics<parallel>], iteration_bounds = array<i64: 1>, scalar_prefetch = 0 : i64, scratch_operands = 0 : i64, tpu.core_type = #tpu.core_type<tc>, window_params = [{transform_indices = @transform_0, window_bounds = array<i64: 4, 128>}, {transform_indices = @transform_1, window_bounds = array<i64: 1>}, {transform_indices = @transform_2, window_bounds = array<i64: 1, 128>}]} {
    %c0 = arith.constant 0 : index
    %c0_0 = arith.constant 0 : index
    %0 = vector.load %arg1[%c0, %c0_0] : memref<4x128xf32, #tpu.memory_space<vmem>>, vector<4x128xf32>
    %1 = vector.extract_strided_slice %0 {offsets = [0, 0], sizes = [1, 128], strides = [1, 1]} : vector<4x128xf32> to vector<1x128xf32>
    %2 = vector.extract_strided_slice %0 {offsets = [1, 0], sizes = [1, 128], strides = [1, 1]} : vector<4x128xf32> to vector<1x128xf32>
    %3 = vector.extract_strided_slice %0 {offsets = [2, 0], sizes = [1, 128], strides = [1, 1]} : vector<4x128xf32> to vector<1x128xf32>
    %4 = vector.extract_strided_slice %0 {offsets = [3, 0], sizes = [1, 128], strides = [1, 1]} : vector<4x128xf32> to vector<1x128xf32>
    %cst = arith.constant 1.000000e+00 : f32
    %5 = vector.broadcast %cst : f32 to vector<1x128xf32>
    %6 = arith.maximumf %4, %5 : vector<1x128xf32>
    %7 = arith.divf %3, %6 : vector<1x128xf32>
    %8 = arith.addf %1, %2 : vector<1x128xf32>
    %9 = arith.addf %8, %7 : vector<1x128xf32>
    %c0_1 = arith.constant 0 : index
    %10 = memref.load %arg2[%c0_1] : memref<1xf32, #tpu.memory_space<smem>>
    %11 = vector.broadcast %10 : f32 to vector<1x128xf32>
    %12 = arith.addf %9, %11 : vector<1x128xf32>
    %13 = arith.negf %12 : vector<1x128xf32>
    %14 = math.exp %13 : vector<1x128xf32>
    %cst_2 = arith.constant 1.000000e+00 : f32
    %15 = vector.broadcast %cst_2 : f32 to vector<1x128xf32>
    %16 = arith.addf %15, %14 : vector<1x128xf32>
    %17 = arith.divf %15, %16 : vector<1x128xf32>
    %c0_3 = arith.constant 0 : index
    %c0_4 = arith.constant 0 : index
    %18 = vector.load %arg3[%c0_3, %c0_4] : memref<1x128xf32, #tpu.memory_space<vmem>>, vector<1x128xf32>
    tpu.vector_store %arg3[%c0_3, %c0_4], %17 {strides = array<i32>} : memref<1x128xf32, #tpu.memory_space<vmem>>, vector<1x128xf32>,
    return
  }
  func.func @transform_0(%arg0: i32) -> (i32, i32) {
    %c0_i32 = arith.constant 0 : i32
    %c0_i32_0 = arith.constant 0 : i32
    return %c0_i32, %arg0 : i32, i32
  }
  func.func @transform_1(%arg0: i32) -> i32 {
    %c0_i32 = arith.constant 0 : i32
    %c0_i32_0 = arith.constant 0 : i32
    return %c0_i32 : i32
  }
  func.func @transform_2(%arg0: i32) -> (i32, i32) {
    %c0_i32 = arith.constant 0 : i32
    %c0_i32_0 = arith.constant 0 : i32
    return %c0_i32, %arg0 : i32, i32
  }
}

</mosaic_0001>

<bundles_post_ra>
// kernel: tpu_custom_call.1
= control target key start
LH: loop header
LB: loop body
LE: loop exit
PB: predicated region body
PF: predicated region fallthrough
CT: control target
= control target key end

     0   :  { %8 = vsyncpa [#allocation4], 0  ;;  %s144_s0 = inlined_call_operand.hbm [shape: f32[4,128], index: 0, kind: input, shape index: {}]   ;;  %s145_s1 = inlined_call_operand.<no memory space> [shape: f32[1], index: 1, kind: input, shape index: {}]   ;;  %s146_s2 = inlined_call_operand.hbm [shape: f32[1,128], index: 2, kind: output, shape index: {}]  }
   0x1   :  { %9 = vsyncpa [#allocation5], 0  ;;  %s118_s9 = smov [#allocation3]  }
   0x2   :  { %s16_s10 = sshll.u32 %s118_s9, 4  ;;  %s17_s10 = int_to_ptr.vmem [resolvable:$true] %s16_s10 }
   0x3   :  { %s82_s11 = scalar_lea.vmem %s17_s10, 64  ;;  %p87_p1 = scmp.lt.s32.totalorder %s17_s10, %s17_s10 }
   0x4   :  { %p83_p0 = scmp.ne.s32.totalorder %s17_s10, %s82_s11  ;;  %p88_p2 = scmp.lt.s32.totalorder %s82_s11, %s82_s11 }
   0x6   :  { %p89_p3 = por %p88_p2, %p87_p1 }
   0x8   :  { %p90_p4 = pnand %p89_p3, %p83_p0 }
   0xa   :  { %93 = shalt.err (!%p90_p4)
}
   0xb   :  { %19 = dma.hbm_to_vmem [thread:$0]  %s144_s0, 64, %s17_s10, [#allocation4]  }
   0xc   :  { %114 = dma.done.wait [#allocation4], 64  }
   0xd   :  { %115 = vsyncadd [#allocation4], 4294967232  ;;  %v25_v0 = vld [vmem:[#allocation3] sm:$0xf]  ;;  %v41_v8 = vstv %s145_s1  ;;  %s119_s0 = smov [#allocation6]  }
   0xe   :  { %v26_v1 = vmax.f32 %v25_v0, 1.0  ;;  %v33_v3 = vrot.slane %v25_v0, 1  ;;  %s56_s16 = sshll.u32 %s119_s0, 4  ;;  %s57_s16 = int_to_ptr.vmem [resolvable:$true] %s56_s16 }
   0xf   :  { %s94_s17 = scalar_lea.vmem %s57_s16, 16  ;;  %s98_s18 = scalar_lea.vmem %s57_s16, 32 }
  0x10   :  { %v28_v2 = vrot.slane %v26_v1, 1  ;;  %v35_v6 = vadd.f32 %v33_v3, %v25_v0  ;;  %p95_p5 = scmp.ne.s32.totalorder %s57_s16, %s94_s17  ;;  %p99_p6 = scmp.lt.s32.totalorder %s57_s16, %s57_s16 }
  0x11   :  { %p100_p7 = scmp.lt.s32.totalorder %s98_s18, %s94_s17 }
  0x12   :  { %68 = vrcp.f32 %v28_v2 }
  0x13   :  { %p101_p8 = por %p100_p7, %p99_p6 }
  0x15   :  { %p102_p9 = pnand %p101_p8, %p95_p5 }
  0x1f   :  { %v69_v4 = vpop.eup %68 }
  0x20   :  { %v31_v5 = vmul.f32 %v69_v4, %v25_v0 }
  0x22   :  { %v37_v7 = vrot.slane %v31_v5, 2 }
  0x24   :  { %v39_v9 = vadd.f32 %v37_v7, %v35_v6 }
  0x26   :  { %v42_v10 = vadd.f32 %v41_v8, %v39_v9 }
  0x28   :  { %v65_v11 = vmul.f32 -1.442695, %v42_v10 }
  0x2a   :  { %70 = vpow2.f32 %v65_v11 }
  0x37   :  { %v71_v12 = vpop.eup %70 }
  0x38   :  { %v46_v13 = vadd.f32 1.0, %v71_v12 }
  0x3a   :  { %72 = vrcp.f32 %v46_v13 }
  0x47   :  { %v73_v14 = vpop.eup %72 }
  0x48   :  { %49 = vst [vmem:[#allocation6] sm:$0x1] %v73_v14 }
  0x49   :  { %105 = shalt.err (!%p102_p9)
}
  0x4a   :  { %59 = dma.vmem_to_hbm [thread:$0]  %s57_s16, 16, %s146_s2, [#allocation5]  }
  0x4b   :  { %116 = dma.done.wait [#allocation5], 16  }
  0x4c   :  { %117 = vsyncadd [#allocation5], 4294967280 }
  0x4d   :  { %63 = vsyncpa [#allocation4], 1 }
  0x4e   :  { %64 = vsyncpa [#allocation5], 1 }

</bundles_post_ra>
